<compile_context>
chip_gen: v6e
topology: v6e:2x2x1
jax: 0.10.0
libtpu: 0.0.40
codegen_flags: <defaults>
</compile_context>

<pallas_src>
import functools

import jax
import jax.numpy as jnp
from jax.experimental import pallas as pl
from jax.experimental.pallas import tpu as pltpu


# -----------------------------------------------------------------------------
# Pallas kernel: fused (matmul -> bias -> relu) x 3 on a tile of rows.
# BN scale is pre-folded into the weights; biases are f32, matmul inputs bf16,
# accumulation in f32 on the MXU.
# -----------------------------------------------------------------------------
def pointnet_kernel(x_ref, w1_ref, w2_ref, w3_ref, b1_ref, b2_ref, b3_ref, o_ref):
    # layer 1: conv1 (kernel=2, expressed as matmul over im2col rows) + BN + ReLU
    h = jnp.dot(x_ref[...], w1_ref[...], preferred_element_type=jnp.float32)
    h = jnp.maximum(h + b1_ref[...], 0.0)
    # layer 2: conv2 (kernel=1 == matmul) + BN + ReLU
    h = jnp.dot(h.astype(jnp.bfloat16), w2_ref[...],
                preferred_element_type=jnp.float32)
    h = jnp.maximum(h + b2_ref[...], 0.0)
    # layer 3: conv3 (kernel=1 == matmul) + BN + ReLU
    h = jnp.dot(h.astype(jnp.bfloat16), w3_ref[...],
                preferred_element_type=jnp.float32)
    o_ref[...] = jnp.maximum(h + b3_ref[...], 0.0)


def _fold_bn(conv_bias, gamma, beta, running_mean, running_var, eps=1e-5):
    """Fold conv bias + eval-mode BatchNorm into (scale, bias) per channel."""
    inv_std = 1.0 / jnp.sqrt(running_var + eps)
    scale = gamma * inv_std
    bias = (conv_bias - running_mean) * scale + beta
    return scale, bias


def _round_up(x, m):
    return ((x + m - 1) // m) * m


@functools.partial(jax.jit, static_argnames=("tm",))
def _pointnet_forward_impl(x, params, tm):
    """x: [B, C, N] float32 -> [B, 1024, N-1] float32 (PyTorch semantics)."""
    B, C, N = x.shape
    L = N - 1                      # conv1d kernel_size=2, stride=1, no padding
    M = B * L

    # ---- glue (plain JAX): points-major layout + k=2 sliding window ----------
    xT = jnp.transpose(x, (0, 2, 1))                                   # [B, N, C]
    # window order is k-major: column index = k*C + c
    x_rows = jnp.concatenate([xT[:, :L, :], xT[:, 1:, :]], axis=-1)    # [B, L, 2C]
    x_rows = x_rows.reshape(M, 2 * C)

    M_pad = _round_up(M, tm)
    x_rows = jnp.pad(x_rows, ((0, M_pad - M), (0, 0))).astype(jnp.bfloat16)

    # ---- fold BN: scale into weight columns (bf16), keep bias in f32 ---------
    s1, b1 = _fold_bn(params["cb1"], params["g1"], params["be1"],
                      params["rm1"], params["rv1"])
    s2, b2 = _fold_bn(params["cb2"], params["g2"], params["be2"],
                      params["rm2"], params["rv2"])
    s3, b3 = _fold_bn(params["cb3"], params["g3"], params["be3"],
                      params["rm3"], params["rv3"])

    # conv weights for right-multiplication; w1 row index = k*C + c
    w1 = jnp.transpose(params["w1"], (2, 1, 0)).reshape(2 * C, 64)     # [2C, 64]
    w2 = params["w2"].reshape(128, 64).T                               # [64, 128]
    w3 = params["w3"].reshape(1024, 128).T                             # [128, 1024]
    w1 = (w1 * s1[None, :]).astype(jnp.bfloat16)
    w2 = (w2 * s2[None, :]).astype(jnp.bfloat16)
    w3 = (w3 * s3[None, :]).astype(jnp.bfloat16)

    b1 = b1[None, :].astype(jnp.float32)
    b2 = b2[None, :].astype(jnp.float32)
    b3 = b3[None, :].astype(jnp.float32)

    grid = (M_pad // tm,)
    full = lambda shape: pl.BlockSpec(shape, lambda i: (0, 0))

    flops = 2 * M_pad * (2 * C * 64 + 64 * 128 + 128 * 1024)
    bytes_accessed = (x_rows.size * 2
                      + (w1.size + w2.size + w3.size) * 2
                      + (b1.size + b2.size + b3.size) * 4
                      + M_pad * 1024 * 4)

    out_rows = pl.pallas_call(
        pointnet_kernel,
        out_shape=jax.ShapeDtypeStruct((M_pad, 1024), jnp.float32),
        grid_spec=pltpu.PrefetchScalarGridSpec(
            num_scalar_prefetch=0,
            grid=grid,
            in_specs=[
                pl.BlockSpec((tm, 2 * C), lambda i: (i, 0)),   # x row tile (bf16)
                full((2 * C, 64)),                              # w1 (bf16, scale folded)
                full((64, 128)),                                # w2
                full((128, 1024)),                              # w3
                full((1, 64)),                                  # b1 (f32)
                full((1, 128)),                                 # b2
                full((1, 1024)),                                # b3
            ],
            out_specs=pl.BlockSpec((tm, 1024), lambda i: (i, 0)),
        ),
        compiler_params=pltpu.CompilerParams(
            dimension_semantics=("parallel",),
            vmem_limit_bytes=48 * 1024 * 1024),
        cost_estimate=pl.CostEstimate(
            flops=flops, transcendentals=0, bytes_accessed=bytes_accessed),
    )(x_rows, w1, w2, w3, b1, b2, b3)

    out_rows = out_rows[:M]                               # drop row padding
    out = out_rows.reshape(B, L, 1024)                    # [B, L, 1024]
    # TODO(synk): if the consumer can take points-major [B, L, 1024], return it
    # directly and skip this extra HBM transpose pass of the largest tensor.
    return jnp.transpose(out, (0, 2, 1))                  # [B, 1024, L]


def pointnet_forward(x, params, tm=512):
    """Public entry point. x: [B, C, N] f32 -> [B, 1024, N-1] f32.

    tm=512 gives ~full MXU utilization on all TPU generations at modest VMEM
    (~10 MiB live); 1024-2048 is also fine on v6e/v7x. The tile is clamped to
    the (16-aligned) row count so tiny inputs don't pad to a full tile.
    """
    B, C, N = x.shape
    M = B * (N - 1)
    tm_eff = min(int(tm), _round_up(M, 16))   # multiple of 16 (bf16 sublane pack)
    return _pointnet_forward_impl(x, params, tm_eff)


# -----------------------------------------------------------------------------
# Deterministic parameter init (shapes from PointNet.__init__, channel=C).
# -----------------------------------------------------------------------------
def init_params(key, channel):
    ks = jax.random.split(key, 6)
    p = {
        "w1": 0.1 * jax.random.normal(ks[0], (64, channel, 2), jnp.float32),
        "cb1": 0.1 * jax.random.normal(ks[1], (64,), jnp.float32),
        "w2": 0.1 * jax.random.normal(ks[2], (128, 64, 1), jnp.float32),
        "cb2": 0.1 * jax.random.normal(ks[3], (128,), jnp.float32),
        "w3": 0.1 * jax.random.normal(ks[4], (1024, 128, 1), jnp.float32),
        "cb3": 0.1 * jax.random.normal(ks[5], (1024,), jnp.float32),
        # BatchNorm params (eval mode): default running stats, affine init = 1/0
        "g1": jnp.ones((64,), jnp.float32), "be1": jnp.zeros((64,), jnp.float32),
        "rm1": jnp.zeros((64,), jnp.float32), "rv1": jnp.ones((64,), jnp.float32),
        "g2": jnp.ones((128,), jnp.float32), "be2": jnp.zeros((128,), jnp.float32),
        "rm2": jnp.zeros((128,), jnp.float32), "rv2": jnp.ones((128,), jnp.float32),
        "g3": jnp.ones((1024,), jnp.float32), "be3": jnp.zeros((1024,), jnp.float32),
        "rm3": jnp.zeros((1024,), jnp.float32), "rv3": jnp.ones((1024,), jnp.float32),
    }
    return p


# -----------------------------------------------------------------------------
# Pure-JAX reference (conv as lax.conv_general_dilated) for a correctness check.
# -----------------------------------------------------------------------------
def pointnet_ref(x, params):
    def conv1d(x, w, b):  # x: [B, C, N], w: [O, C, K]
        y = jax.lax.conv_general_dilated(
            x, w, window_strides=(1,), padding="VALID",
            dimension_numbers=("NCH", "OIH", "NCH"))
        return y + b[None, :, None]

    def bn_relu(x, g, be, rm, rv, eps=1e-5):
        y = (x - rm[None, :, None]) / jnp.sqrt(rv[None, :, None] + eps)
        return jax.nn.relu(y * g[None, :, None] + be[None, :, None])

    h = bn_relu(conv1d(x, params["w1"], params["cb1"]),
                params["g1"], params["be1"], params["rm1"], params["rv1"])
    h = bn_relu(conv1d(h, params["w2"], params["cb2"]),
                params["g2"], params["be2"], params["rm2"], params["rv2"])
    h = bn_relu(conv1d(h, params["w3"], params["cb3"]),
                params["g3"], params["be3"], params["rm3"], params["rv3"])
    return h


if __name__ == "__main__":
    key = jax.random.PRNGKey(0)
    B, C, N = 2, 4, 16
    kx, kp = jax.random.split(key)
    x = jax.random.normal(kx, (B, C, N), jnp.float32)
    params = init_params(kp, C)

    out = pointnet_forward(x, params)
    out = jax.block_until_ready(out)
    assert out.shape == (B, 1024, N - 1), out.shape

    ref = pointnet_ref(x, params)
    # bf16 matmul inputs with f32 accumulation -> relaxed tolerance
    assert jnp.allclose(out, ref, atol=3e-2, rtol=3e-2), "mismatch vs reference"

    print("KERNEL_OK")
</pallas_src>

<mosaic_0001>
module attributes {stable_mosaic.version = 11 : i64} {
  func.func @pointnet_kernel(%arg0: i32, %arg1: memref<32x8xbf16, #tpu.memory_space<vmem>>, %arg2: memref<8x64xbf16, #tpu.memory_space<vmem>>, %arg3: memref<64x128xbf16, #tpu.memory_space<vmem>>, %arg4: memref<128x1024xbf16, #tpu.memory_space<vmem>>, %arg5: memref<1x64xf32, #tpu.memory_space<vmem>>, %arg6: memref<1x128xf32, #tpu.memory_space<vmem>>, %arg7: memref<1x1024xf32, #tpu.memory_space<vmem>>, %arg8: memref<32x1024xf32, #tpu.memory_space<vmem>>) attributes {dimension_semantics = [#tpu.dimension_semantics<parallel>], iteration_bounds = array<i64: 1>, scalar_prefetch = 0 : i64, scratch_operands = 0 : i64, tpu.core_type = #tpu.core_type<tc>, window_params = [{transform_indices = @transform_0, window_bounds = array<i64: 32, 8>}, {pipeline_mode = #tpu.pipeline_mode<synchronous>, transform_indices = @transform_1, window_bounds = array<i64: 8, 64>}, {pipeline_mode = #tpu.pipeline_mode<synchronous>, transform_indices = @transform_2, window_bounds = array<i64: 64, 128>}, {pipeline_mode = #tpu.pipeline_mode<synchronous>, transform_indices = @transform_3, window_bounds = array<i64: 128, 1024>}, {pipeline_mode = #tpu.pipeline_mode<synchronous>, transform_indices = @transform_4, window_bounds = array<i64: 1, 64>}, {pipeline_mode = #tpu.pipeline_mode<synchronous>, transform_indices = @transform_5, window_bounds = array<i64: 1, 128>}, {pipeline_mode = #tpu.pipeline_mode<synchronous>, transform_indices = @transform_6, window_bounds = array<i64: 1, 1024>}, {transform_indices = @transform_7, window_bounds = array<i64: 32, 1024>}]} {
    %c0 = arith.constant 0 : index
    %c0_0 = arith.constant 0 : index
    %0 = vector.load %arg1[%c0, %c0_0] : memref<32x8xbf16, #tpu.memory_space<vmem>>, vector<32x8xbf16>
    %c0_1 = arith.constant 0 : index
    %c0_2 = arith.constant 0 : index
    %1 = vector.load %arg2[%c0_1, %c0_2] : memref<8x64xbf16, #tpu.memory_space<vmem>>, vector<8x64xbf16>
    %cst = arith.constant dense<0.000000e+00> : vector<32x64xf32>
    %2 = tpu.matmul %0, %1, %cst {dimension_numbers = #tpu.dot_dimension_numbers<[1], [0], [0], [1], [0, 0, 1, 1], [], []>} : vector<32x8xbf16>, vector<8x64xbf16>, vector<32x64xf32> -> vector<32x64xf32>
    %c0_3 = arith.constant 0 : index
    %c0_4 = arith.constant 0 : index
    %3 = vector.load %arg5[%c0_3, %c0_4] : memref<1x64xf32, #tpu.memory_space<vmem>>, vector<1x64xf32>
    %4 = vector.broadcast %3 : vector<1x64xf32> to vector<32x64xf32>
    %5 = arith.addf %2, %4 : vector<32x64xf32>
    %cst_5 = arith.constant 0.000000e+00 : f32
    %6 = vector.broadcast %cst_5 : f32 to vector<32x64xf32>
    %7 = arith.maximumf %5, %6 : vector<32x64xf32>
    %8 = arith.truncf %7 : vector<32x64xf32> to vector<32x64xbf16>
    %c0_6 = arith.constant 0 : index
    %c0_7 = arith.constant 0 : index
    %9 = vector.load %arg3[%c0_6, %c0_7] : memref<64x128xbf16, #tpu.memory_space<vmem>>, vector<64x128xbf16>
    %cst_8 = arith.constant dense<0.000000e+00> : vector<32x128xf32>
    %10 = tpu.matmul %8, %9, %cst_8 {dimension_numbers = #tpu.dot_dimension_numbers<[1], [0], [0], [1], [0, 0, 1, 1], [], []>} : vector<32x64xbf16>, vector<64x128xbf16>, vector<32x128xf32> -> vector<32x128xf32>
    %c0_9 = arith.constant 0 : index
    %c0_10 = arith.constant 0 : index
    %11 = vector.load %arg6[%c0_9, %c0_10] : memref<1x128xf32, #tpu.memory_space<vmem>>, vector<1x128xf32>
    %12 = vector.broadcast %11 : vector<1x128xf32> to vector<32x128xf32>
    %13 = arith.addf %10, %12 : vector<32x128xf32>
    %cst_11 = arith.constant 0.000000e+00 : f32
    %14 = vector.broadcast %cst_11 : f32 to vector<32x128xf32>
    %15 = arith.maximumf %13, %14 : vector<32x128xf32>
    %16 = arith.truncf %15 : vector<32x128xf32> to vector<32x128xbf16>
    %c0_12 = arith.constant 0 : index
    %c0_13 = arith.constant 0 : index
    %17 = vector.load %arg4[%c0_12, %c0_13] : memref<128x1024xbf16, #tpu.memory_space<vmem>>, vector<128x1024xbf16>
    %cst_14 = arith.constant dense<0.000000e+00> : vector<32x1024xf32>
    %18 = tpu.matmul %16, %17, %cst_14 {dimension_numbers = #tpu.dot_dimension_numbers<[1], [0], [0], [1], [0, 0, 1, 1], [], []>} : vector<32x128xbf16>, vector<128x1024xbf16>, vector<32x1024xf32> -> vector<32x1024xf32>
    %c0_15 = arith.constant 0 : index
    %c0_16 = arith.constant 0 : index
    %19 = vector.load %arg7[%c0_15, %c0_16] : memref<1x1024xf32, #tpu.memory_space<vmem>>, vector<1x1024xf32>
    %20 = vector.broadcast %19 : vector<1x1024xf32> to vector<32x1024xf32>
    %21 = arith.addf %18, %20 : vector<32x1024xf32>
    %cst_17 = arith.constant 0.000000e+00 : f32
    %22 = vector.broadcast %cst_17 : f32 to vector<32x1024xf32>
    %23 = arith.maximumf %21, %22 : vector<32x1024xf32>
    %c0_18 = arith.constant 0 : index
    %c0_19 = arith.constant 0 : index
    %24 = vector.load %arg8[%c0_18, %c0_19] : memref<32x1024xf32, #tpu.memory_space<vmem>>, vector<32x1024xf32>
    tpu.vector_store %arg8[%c0_18, %c0_19], %23 {strides = array<i32>} : memref<32x1024xf32, #tpu.memory_space<vmem>>, vector<32x1024xf32>,
    return
  }
  func.func @transform_0(%arg0: i32) -> (i32, i32) {
    %c0_i32 = arith.constant 0 : i32
    %c0_i32_0 = arith.constant 0 : i32
    return %arg0, %c0_i32 : i32, i32
  }
  func.func @transform_1(%arg0: i32) -> (i32, i32) {
    %c0_i32 = arith.constant 0 : i32
    %c0_i32_0 = arith.constant 0 : i32
    %c0_i32_1 = arith.constant 0 : i32
    return %c0_i32, %c0_i32_0 : i32, i32
  }
  func.func @transform_2(%arg0: i32) -> (i32, i32) {
    %c0_i32 = arith.constant 0 : i32
    %c0_i32_0 = arith.constant 0 : i32
    %c0_i32_1 = arith.constant 0 : i32
    return %c0_i32, %c0_i32_0 : i32, i32
  }
  func.func @transform_3(%arg0: i32) -> (i32, i32) {
    %c0_i32 = arith.constant 0 : i32
    %c0_i32_0 = arith.constant 0 : i32
    %c0_i32_1 = arith.constant 0 : i32
    return %c0_i32, %c0_i32_0 : i32, i32
  }
  func.func @transform_4(%arg0: i32) -> (i32, i32) {
    %c0_i32 = arith.constant 0 : i32
    %c0_i32_0 = arith.constant 0 : i32
    %c0_i32_1 = arith.constant 0 : i32
    return %c0_i32, %c0_i32_0 : i32, i32
  }
  func.func @transform_5(%arg0: i32) -> (i32, i32) {
    %c0_i32 = arith.constant 0 : i32
    %c0_i32_0 = arith.constant 0 : i32
    %c0_i32_1 = arith.constant 0 : i32
    return %c0_i32, %c0_i32_0 : i32, i32
  }
  func.func @transform_6(%arg0: i32) -> (i32, i32) {
    %c0_i32 = arith.constant 0 : i32
    %c0_i32_0 = arith.constant 0 : i32
    %c0_i32_1 = arith.constant 0 : i32
    return %c0_i32, %c0_i32_0 : i32, i32
  }
  func.func @transform_7(%arg0: i32) -> (i32, i32) {
    %c0_i32 = arith.constant 0 : i32
    %c0_i32_0 = arith.constant 0 : i32
    return %arg0, %c0_i32 : i32, i32
  }
}

</mosaic_0001>

<bundles_post_ra>
// kernel: _pointnet_forward_impl.1
= control target key start
LH: loop header
LB: loop body
LE: loop exit
PB: predicated region body
PF: predicated region fallthrough
CT: control target
= control target key end

     0   :  { %vm56_vm0 = vcmask 1043456   ;;  %vm49_vm1 = vcmask 64512   ;;  %vm154_vm2 = vcmask 523264   ;;  %s1432_s1 = inlined_call_operand.vmem [shape: bf16[8,64], index: 1, kind: input, shape index: {}]   ;;  %s1433_s0 = inlined_call_operand.vmem [shape: bf16[32,8], index: 0, kind: input, shape index: {}]   ;;  %s1434_s2 = inlined_call_operand.vmem [shape: bf16[64,128], index: 2, kind: input, shape index: {}]   ;;  %s1435_s3 = inlined_call_operand.vmem [shape: bf16[128,1024], index: 3, kind: input, shape index: {}]   ;;  %s1436_s4 = inlined_call_operand.vmem [shape: f32[1,64], index: 4, kind: input, shape index: {}]   ;;  %s1437_s5 = inlined_call_operand.vmem [shape: f32[1,128], index: 5, kind: input, shape index: {}]   ;;  %s1438_s6 = inlined_call_operand.vmem [shape: f32[1,1024], index: 6, kind: input, shape index: {}]   ;;  %s1439_s7 = inlined_call_operand.vmem [shape: f32[32,1024], index: 7, kind: output, shape index: {}]  }
   0x1   :  { %v31_v0 = vld [vmem:[%s1432_s1] sm:$0xf]  ;;  %v1028_v3 = vld [vmem:[%s1433_s0 + $0x8] sm:$0xff]   ;;  %v1029_v4 = vld [vmem:[%s1434_s2 + $0x18] sm:$0xff]  }
   0x2   :  { %1025 = vmatprep.subr.msk.bf16.mxu0 %vm56_vm0, %v31_v0  ;;  %v58_v1 = vsel %vm56_vm0, %v31_v0, 0  ;;  %v1027_v2 = vld [vmem:[%s1433_s0] sm:$0xff]   ;;  %1013 = vmatprep.subr.bf16.mxu1 %v1029_v4  ;;  %v1030_v5 = vld [vmem:[%s1434_s2 + $0x10] sm:$0xff]   ;;  %v1031_v6 = vld [vmem:[%s1434_s2 + $0x8] sm:$0xff]  }
   0x3   :  { %1008 = vmatpush3.bf16.msra.mxu0 %v58_v1  ;;  %1009 = vmatprep.mubr.msk.bf16.mxu0 %vm49_vm1, %v1027_v2  ;;  %v1032_v7 = vld [vmem:[%s1434_s2] sm:$0xff]   ;;  %v273_v10 = vld [vmem:[%s1435_s3 + $0x1c8] sm:$0xff] }
   0x4   :  { %1014 = vmatpush3.bf16.msra.mxu1 %v1029_v4  ;;  %v272_v8 = vld [vmem:[%s1435_s3 + $0x1c0] sm:$0xff]  ;;  %v277_v13 = vld [vmem:[%s1435_s3 + $0x1e8] sm:$0xff] }
   0x5   :  { %1015 = vmatprep.subr.bf16.mxu1 %v1030_v5  ;;  %v276_v9 = vld [vmem:[%s1435_s3 + $0x1e0] sm:$0xff]  ;;  %v992_v16 = vcombine.low %v273_v10, %v277_v13  ;;  %v993_v17 = vcombine.high %v273_v10, %v277_v13  ;;  %v265_v44 = vld [vmem:[%s1435_s3 + $0x188] sm:$0xff] }
   0x6   :  { %1010 = vmatmul.mubr.msk.bf16.vlgmr.msra.gmra.mxu0 %vm49_vm1, %v1028_v3  ;;  %v990_v11 = vcombine.low %v272_v8, %v276_v9  ;;  %v991_v12 = vcombine.high %v272_v8, %v276_v9  ;;  %v264_v14 = vld [vmem:[%s1435_s3 + $0x180] sm:$0xff]  ;;  %v269_v45 = vld [vmem:[%s1435_s3 + $0x1a8] sm:$0xff] }
   0x7   :  { %v268_v15 = vld [vmem:[%s1435_s3 + $0x1a0] sm:$0xff]  ;;  %v985_v49 = vcombine.high %v265_v44, %v269_v45  ;;  %v257_v50 = vld [vmem:[%s1435_s3 + $0x148] sm:$0xff]  ;;  %v984_v52 = vcombine.low %v265_v44, %v269_v45 }
   0x8   :  { %1016 = vmatpush3.bf16.msra.mxu1 %v1030_v5  ;;  %v983_v18 = vcombine.high %v264_v14, %v268_v15  ;;  %642 = vmatprep.subr.bf16.mxu0 %v991_v12  ;;  %v982_v19 = vcombine.low %v264_v14, %v268_v15  ;;  %v256_v20 = vld [vmem:[%s1435_s3 + $0x140] sm:$0xff]  ;;  %v261_v51 = vld [vmem:[%s1435_s3 + $0x168] sm:$0xff] }
   0x9   :  { %1017 = vmatprep.subr.bf16.mxu1 %v1031_v6  ;;  %643 = vmatpush1.bf16.msra.mxu0 %v990_v11  ;;  %v260_v21 = vld [vmem:[%s1435_s3 + $0x160] sm:$0xff]  ;;  %v977_v53 = vcombine.high %v257_v50, %v261_v51  ;;  %v249_v54 = vld [vmem:[%s1435_s3 + $0x108] sm:$0xff]  ;;  %v976_v56 = vcombine.low %v257_v50, %v261_v51  ;;  %v262_v50 = vld [vmem:[%s1435_s3 + $0x170] sm:$0xff] }
   0xa   :  { %644 = vmatprep.subr.bf16.mxu0 %v983_v18  ;;  %v975_v22 = vcombine.high %v256_v20, %v260_v21  ;;  %v974_v23 = vcombine.low %v256_v20, %v260_v21  ;;  %v248_v24 = vld [vmem:[%s1435_s3 + $0x100] sm:$0xff]  ;;  %v253_v55 = vld [vmem:[%s1435_s3 + $0x128] sm:$0xff]  ;;  %v259_v51 = vld [vmem:[%s1435_s3 + $0x158] sm:$0xff] }
   0xb   :  { %v252_v25 = vld [vmem:[%s1435_s3 + $0x120] sm:$0xff]  ;;  %v969_v57 = vcombine.high %v249_v54, %v253_v55  ;;  %v241_v58 = vld [vmem:[%s1435_s3 + $0xc8] sm:$0xff]  ;;  %v968_v60 = vcombine.low %v249_v54, %v253_v55 }
   0xc   :  { %1018 = vmatpush3.bf16.msra.mxu1 %v1031_v6  ;;  %v967_v26 = vcombine.high %v248_v24, %v252_v25  ;;  %v966_v27 = vcombine.low %v248_v24, %v252_v25  ;;  %v240_v28 = vld [vmem:[%s1435_s3 + $0xc0] sm:$0xff]  ;;  %v245_v59 = vld [vmem:[%s1435_s3 + $0xe8] sm:$0xff]  ;;  %v278_v24 = vld [vmem:[%s1435_s3 + $0x1f0] sm:$0xff] }
   0xd   :  { %1019 = vmatprep.subr.bf16.mxu1 %v1032_v7  ;;  %645 = vmatpush1.bf16.msra.mxu0 %v982_v19  ;;  %v244_v29 = vld [vmem:[%s1435_s3 + $0xe0] sm:$0xff]  ;;  %v961_v61 = vcombine.high %v241_v58, %v245_v59  ;;  %v960_v62 = vcombine.low %v241_v58, %v245_v59  ;;  %v233_v1 = vld [vmem:[%s1435_s3 + $0x88] sm:$0xff]  ;;  %v275_v25 = vld [vmem:[%s1435_s3 + $0x1d8] sm:$0xff] }
   0xe   :  { %646 = vmatprep.subr.bf16.mxu0 %v975_v22  ;;  %v959_v30 = vcombine.high %v240_v28, %v244_v29  ;;  %v958_v31 = vcombine.low %v240_v28, %v244_v29  ;;  %v922_v34 = vld [vmem:[%s1436_s4] ss:$0 sm:$0xff]  ;;  %v237_v3 = vld [vmem:[%s1435_s3 + $0xa8] sm:$0xff]  ;;  %v250_v59 = vld [vmem:[%s1435_s3 + $0x110] sm:$0xff] }
   0xf   :  { %v232_v63 = vld [vmem:[%s1435_s3 + $0x80] sm:$0xff]  ;;  %v952_v5 = vcombine.low %v233_v1, %v237_v3  ;;  %v953_v6 = vcombine.high %v233_v1, %v237_v3  ;;  %v225_v9 = vld [vmem:[%s1435_s3 + $0x48] sm:$0xff] }
  0x10   :  { %1020 = vmatpush3.bf16.msra.mxu1 %v1032_v7  ;;  %v236_v0 = vld [vmem:[%s1435_s3 + $0xa0] sm:$0xff]  ;;  %v229_v11 = vld [vmem:[%s1435_s3 + $0x68] sm:$0xff] }
  0x11   :  { %695 = vmatprep.subr.bf16.mxu1 %v993_v17  ;;  %647 = vmatpush1.bf16.msra.mxu0 %v974_v23  ;;  %v951_v2 = vcombine.high %v232_v63, %v236_v0  ;;  %v950_v4 = vcombine.low %v232_v63, %v236_v0  ;;  %v224_v7 = vld [vmem:[%s1435_s3 + $0x40] sm:$0xff]  ;;  %v944_v13 = vcombine.low %v225_v9, %v229_v11  ;;  %v217_v17 = vld [vmem:[%s1435_s3 + $0x8] sm:$0xff]  ;;  %v274_v23 = vld [vmem:[%s1435_s3 + $0x1d0] sm:$0xff] }
  0x12   :  { %648 = vmatprep.subr.bf16.mxu0 %v967_v26  ;;  %v228_v8 = vld [vmem:[%s1435_s3 + $0x60] sm:$0xff]  ;;  %v945_v14 = vcombine.high %v225_v9, %v229_v11  ;;  %v221_v19 = vld [vmem:[%s1435_s3 + $0x28] sm:$0xff]  ;;  %v995_v26 = vcombine.high %v274_v23, %v278_v24  ;;  %v994_v28 = vcombine.low %v274_v23, %v278_v24  ;;  %v227_v23 = vld [vmem:[%s1435_s3 + $0x58] sm:$0xff] }
  0x13   :  { %v943_v10 = vcombine.high %v224_v7, %v228_v8  ;;  %v942_v12 = vcombine.low %v224_v7, %v228_v8  ;;  %v216_v15 = vld [vmem:[%s1435_s3] sm:$0xff]  ;;  %v936_v21 = vcombine.low %v217_v17, %v221_v19  ;;  %v937_v22 = vcombine.high %v217_v17, %v221_v19  ;;  %v243_v7 = vld [vmem:[%s1435_s3 + $0xd8] sm:$0xff] }
  0x14   :  { %v247_v8 = vld [vmem:[%s1435_s3 + $0xf8] sm:$0xff] }
  0x15   :  { %649 = vmatpush1.bf16.msra.mxu0 %v966_v27  ;;  %v279_v27 = vld [vmem:[%s1435_s3 + $0x1f8] sm:$0xff] }
  0x16   :  { %650 = vmatprep.subr.bf16.mxu0 %v959_v30  ;;  %v996_v29 = vcombine.low %v275_v25, %v279_v27  ;;  %v997_v30 = vcombine.high %v275_v25, %v279_v27  ;;  %v231_v24 = vld [vmem:[%s1435_s3 + $0x78] sm:$0xff] }
  0x19   :  { %651 = vmatpush1.bf16.msra.mxu0 %v958_v31  ;;  %v1033_v31 = vmov 0  }
  0x1a   :  { %652 = vmatprep.subr.bf16.mxu0 %v951_v2  ;;  %674 = vmatprep.mubr.bf16.mxu0 %v1033_v31 }
  0x1d   :  { %653 = vmatpush1.bf16.msra.mxu0 %v950_v4 }
  0x1e   :  { %654 = vmatprep.subr.bf16.mxu0 %v943_v10 }
  0x21   :  { %655 = vmatpush1.bf16.msra.mxu0 %v942_v12  ;;  %v965_v12 = vcombine.high %v243_v7, %v247_v8 }
  0xc6   :  { %v1011_v32 = vpop.f32.mrf.mxu0 }
  0xc7   :  { %v103_v38 = vadd.f32 %v1011_v32, %v922_v34 }
  0xc8   :  { %v94_v33 = vpop.f32.mrf.mxu0 }
  0xc9   :  { %v95_v36 = vadd.f32 %v922_v34, %v94_v33  ;;  %v111_v46 = vmax.f32 %v103_v38, 0.0 }
  0xca   :  { %v1012_v35 = vpop.f32.mrf.mxu0 }
  0xcb   :  { %v106_v37 = vadd.f32 %v1012_v35, %v922_v34  ;;  %v109_v42 = vmax.f32 %v95_v36, 0.0 }
  0xcc   :  { %v97_v39 = vpop.f32.mrf.mxu0 }
  0xcd   :  { %v98_v40 = vadd.f32 %v922_v34, %v97_v39  ;;  %v112_v41 = vmax.f32 %v106_v37, 0.0  ;;  %v927_v34 = vld [vmem:[%s1437_s5] ss:$0 sm:$0xff]  ;;  %v266_v39 = vld [vmem:[%s1435_s3 + $0x190] sm:$0xff] }
  0xcf   :  { %v110_v43 = vmax.f32 %v98_v40, 0.0  ;;  %v114_v48 = vpack.c.bf16 %v112_v41, %v111_v46  ;;  %v270_v40 = vld [vmem:[%s1435_s3 + $0x1b0] sm:$0xff]  ;;  %v267_v41 = vld [vmem:[%s1435_s3 + $0x198] sm:$0xff] }
  0xd0   :  { %v986_v54 = vcombine.low %v266_v39, %v270_v40 }
  0xd1   :  { %v113_v47 = vpack.c.bf16 %v110_v43, %v109_v42  ;;  %v271_v42 = vld [vmem:[%s1435_s3 + $0x1b8] sm:$0xff] }
  0xd2   :  { %v988_v55 = vcombine.low %v267_v41, %v271_v42 }
  0xd3   :  { %1021 = vmatprep.mubr.msk.bf16.mxu1 %vm154_vm2, %v113_v47  ;;  %v987_v47 = vcombine.high %v266_v39, %v270_v40  ;;  %v282_v40 = vlaneseq }
  0xd4   :  { %1022 = vmatmul.mubr.msk.bf16.vlgmr.msra.gmra.mxu1 %vm154_vm2, %v114_v48  ;;  %v989_v48 = vcombine.high %v267_v41, %v271_v42 }
  0xd5   :  { %696 = vmatpush1.bf16.msra.mxu1 %v992_v16  ;;  %v220_v16 = vld [vmem:[%s1435_s3 + $0x20] sm:$0xff]  ;;  %727 = vmatprep.mubr.bf16.mxu1 %v1033_v31  ;;  %v1313_v41 = vshrl.u32 %v282_v40, 7 }
  0xd6   :  { %697 = vmatprep.subr.bf16.mxu1 %v985_v49  ;;  %v935_v18 = vcombine.high %v216_v15, %v220_v16  ;;  %v934_v20 = vcombine.low %v216_v15, %v220_v16  ;;  %v258_v49 = vld [vmem:[%s1435_s3 + $0x150] sm:$0xff]  ;;  %v235_v15 = vld [vmem:[%s1435_s3 + $0x98] sm:$0xff] }
  0xd7   :  { %v978_v0 = vcombine.low %v258_v49, %v262_v50  ;;  %v239_v16 = vld [vmem:[%s1435_s3 + $0xb8] sm:$0xff]  ;;  %v284_v42 = vsub.s32 0, %v1313_v41 }
  0xd8   :  { %656 = vmatprep.subr.bf16.mxu0 %v935_v18  ;;  %v964_v18 = vcombine.low %v243_v7, %v247_v8 }
  0xd9   :  { %698 = vmatpush1.bf16.msra.mxu1 %v984_v52  ;;  %657 = vmatpush1.bf16.msra.mxu0 %v934_v20  ;;  %v263_v52 = vld [vmem:[%s1435_s3 + $0x178] sm:$0xff]  ;;  %v957_v20 = vcombine.high %v235_v15, %v239_v16 }
  0xda   :  { %699 = vmatprep.subr.bf16.mxu1 %v977_v53  ;;  %748 = vmatprep.subr.bf16.mxu0 %v995_v26  ;;  %v981_v58 = vcombine.high %v259_v51, %v263_v52  ;;  %v980_v1 = vcombine.low %v259_v51, %v263_v52  ;;  %v956_v26 = vcombine.low %v235_v15, %v239_v16 }
  0xdd   :  { %700 = vmatpush1.bf16.msra.mxu1 %v976_v56 }
  0xde   :  { %701 = vmatprep.subr.bf16.mxu1 %v969_v57  ;;  %v979_v57 = vcombine.high %v258_v49, %v262_v50 }
  0xe1   :  { %702 = vmatpush1.bf16.msra.mxu1 %v968_v60  ;;  %v254_v60 = vld [vmem:[%s1435_s3 + $0x130] sm:$0xff] }
  0xe2   :  { %703 = vmatprep.subr.bf16.mxu1 %v961_v61  ;;  %v251_v61 = vld [vmem:[%s1435_s3 + $0x118] sm:$0xff]  ;;  %v971_v3 = vcombine.high %v250_v59, %v254_v60  ;;  %v970_v9 = vcombine.low %v250_v59, %v254_v60 }
  0xe5   :  { %704 = vmatpush1.bf16.msra.mxu1 %v960_v62  ;;  %v255_v62 = vld [vmem:[%s1435_s3 + $0x138] sm:$0xff] }
  0xe6   :  { %705 = vmatprep.subr.bf16.mxu1 %v953_v6  ;;  %v973_v4 = vcombine.high %v251_v61, %v255_v62  ;;  %v246_v6 = vld [vmem:[%s1435_s3 + $0xf0] sm:$0xff]  ;;  %v972_v10 = vcombine.low %v251_v61, %v255_v62 }
  0xe9   :  { %706 = vmatpush1.bf16.msra.mxu1 %v952_v5  ;;  %v242_v5 = vld [vmem:[%s1435_s3 + $0xd0] sm:$0xff] }
  0xea   :  { %707 = vmatprep.subr.bf16.mxu1 %v945_v14  ;;  %v963_v11 = vcombine.high %v242_v5, %v246_v6  ;;  %v238_v14 = vld [vmem:[%s1435_s3 + $0xb0] sm:$0xff]  ;;  %v962_v17 = vcombine.low %v242_v5, %v246_v6 }
  0xed   :  { %708 = vmatpush1.bf16.msra.mxu1 %v944_v13  ;;  %v234_v13 = vld [vmem:[%s1435_s3 + $0x90] sm:$0xff] }
  0xee   :  { %709 = vmatprep.subr.bf16.mxu1 %v937_v22  ;;  %v955_v19 = vcombine.high %v234_v13, %v238_v14  ;;  %v230_v22 = vld [vmem:[%s1435_s3 + $0x70] sm:$0xff]  ;;  %v954_v25 = vcombine.low %v234_v13, %v238_v14 }
  0xf1   :  { %710 = vmatpush1.bf16.msra.mxu1 %v936_v21  ;;  %v226_v21 = vld [vmem:[%s1435_s3 + $0x50] sm:$0xff] }
  0xf2   :  { %801 = vmatprep.subr.bf16.mxu1 %v997_v30  ;;  %v947_v27 = vcombine.high %v226_v21, %v230_v22  ;;  %v222_v30 = vld [vmem:[%s1435_s3 + $0x30] sm:$0xff] }
 0x194   :  { %v1023_v32 = vpop.f32.mrf.mxu1 }
 0x195   :  { %v204_v53 = vadd.f32 %v1023_v32, %v927_v34  ;;  %v219_v32 = vld [vmem:[%s1435_s3 + $0x18] sm:$0xff] }
 0x196   :  { %v195_v33 = vpop.f32.mrf.mxu1 }
 0x197   :  { %v196_v36 = vadd.f32 %v927_v34, %v195_v33  ;;  %v212_v63 = vmax.f32 %v204_v53, 0.0  ;;  %v223_v33 = vld [vmem:[%s1435_s3 + $0x38] sm:$0xff] }
 0x198   :  { %v1024_v35 = vpop.f32.mrf.mxu1  ;;  %v940_v39 = vcombine.low %v219_v32, %v223_v33 }
 0x199   :  { %v210_v43 = vmax.f32 %v196_v36, 0.0  ;;  %v207_v45 = vadd.f32 %v1024_v35, %v927_v34  ;;  %v948_v35 = vcombine.low %v227_v23, %v231_v24 }
 0x19a   :  { %v198_v37 = vpop.f32.mrf.mxu1 }
 0x19b   :  { %v199_v38 = vadd.f32 %v927_v34, %v198_v37  ;;  %v213_v56 = vmax.f32 %v207_v45, 0.0  ;;  %v946_v34 = vcombine.low %v226_v21, %v230_v22  ;;  %v941_v37 = vcombine.high %v219_v32, %v223_v33 }
 0x19c   :  { %v288_v45 = vsub.s32 1, %v1313_v41 }
 0x19d   :  { %v211_v44 = vmax.f32 %v199_v38, 0.0  ;;  %v1253_v2 = vpack.c.bf16 %v213_v56, %v212_v63 }
 0x19f   :  { %v1223_v46 = vpack.c.bf16 %v211_v44, %v210_v43  ;;  %v292_v43 = vsub.s32 2, %v1313_v41  ;;  %v1320_v44 = vld [vmem:[%s1438_s6] sm:$0xff] }
 0x1a1   :  { %675 = vmatmul.mubr.bf16.vlgmr.msra.gmra.mxu0 %v1223_v46  ;;  %728 = vmatmul.mubr.bf16.vlgmr.msra.gmra.mxu1 %v1223_v46 }
 0x1a2   :  { %749 = vmatpush1.bf16.msra.mxu0 %v994_v28  ;;  %802 = vmatpush1.bf16.msra.mxu1 %v996_v29  ;;  %v949_v28 = vcombine.high %v227_v23, %v231_v24  ;;  %v218_v29 = vld [vmem:[%s1435_s3 + $0x10] sm:$0xff] }
 0x1a3   :  { %750 = vmatprep.subr.bf16.mxu0 %v987_v47  ;;  %803 = vmatprep.subr.bf16.mxu1 %v989_v48  ;;  %v939_v36 = vcombine.high %v218_v29, %v222_v30  ;;  %v938_v38 = vcombine.low %v218_v29, %v222_v30  ;;  %v293_v47 = vrot.slane %v1320_v44, %v292_v43 }
 0x1a4   :  { %684 = vmatprep.mubr.bf16.mxu0 %v1033_v31  ;;  %737 = vmatprep.mubr.bf16.mxu1 %v1033_v31  ;;  %v289_v48 = vrot.slane %v1320_v44, %v288_v45 }
 0x1a6   :  { %751 = vmatpush1.bf16.msra.mxu0 %v986_v54  ;;  %804 = vmatpush1.bf16.msra.mxu1 %v988_v55 }
 0x1a7   :  { %752 = vmatprep.subr.bf16.mxu0 %v979_v57  ;;  %805 = vmatprep.subr.bf16.mxu1 %v981_v58 }
 0x1a9   :  { %685 = vmatmul.mubr.bf16.gmra.mxu0 %v1253_v2  ;;  %738 = vmatmul.mubr.bf16.gmra.mxu1 %v1253_v2 }
 0x1aa   :  { %753 = vmatpush1.bf16.msra.mxu0 %v978_v0  ;;  %806 = vmatpush1.bf16.msra.mxu1 %v980_v1 }
 0x1ab   :  { %754 = vmatprep.subr.bf16.mxu0 %v971_v3  ;;  %807 = vmatprep.subr.bf16.mxu1 %v973_v4 }
 0x1ac   :  { %780 = vmatprep.mubr.bf16.mxu0 %v1033_v31  ;;  %833 = vmatprep.mubr.bf16.mxu1 %v1033_v31 }
 0x1ae   :  { %755 = vmatpush1.bf16.msra.mxu0 %v970_v9  ;;  %808 = vmatpush1.bf16.msra.mxu1 %v972_v10 }
 0x1af   :  { %756 = vmatprep.subr.bf16.mxu0 %v963_v11  ;;  %809 = vmatprep.subr.bf16.mxu1 %v965_v12 }
 0x1b2   :  { %757 = vmatpush1.bf16.msra.mxu0 %v962_v17  ;;  %810 = vmatpush1.bf16.msra.mxu1 %v964_v18 }
 0x1b3   :  { %758 = vmatprep.subr.bf16.mxu0 %v955_v19  ;;  %811 = vmatprep.subr.bf16.mxu1 %v957_v20 }
 0x1b6   :  { %759 = vmatpush1.bf16.msra.mxu0 %v954_v25  ;;  %812 = vmatpush1.bf16.msra.mxu1 %v956_v26 }
 0x1b7   :  { %760 = vmatprep.subr.bf16.mxu0 %v947_v27  ;;  %813 = vmatprep.subr.bf16.mxu1 %v949_v28 }
 0x1ba   :  { %761 = vmatpush1.bf16.msra.mxu0 %v946_v34  ;;  %814 = vmatpush1.bf16.msra.mxu1 %v948_v35  ;;  %v300_v35 = vsub.s32 4, %v1313_v41 }
 0x1bb   :  { %762 = vmatprep.subr.bf16.mxu0 %v939_v36  ;;  %815 = vmatprep.subr.bf16.mxu1 %v941_v37  ;;  %v308_v36 = vsub.s32 6, %v1313_v41  ;;  %v304_v37 = vsub.s32 5, %v1313_v41 }
 0x1bd   :  { %v309_v40 = vrot.slane %v1320_v44, %v308_v36 }
 0x1be   :  { %763 = vmatpush1.bf16.msra.mxu0 %v938_v38  ;;  %816 = vmatpush1.bf16.msra.mxu1 %v940_v39  ;;  %v312_v38 = vsub.s32 7, %v1313_v41  ;;  %v301_v39 = vrot.slane %v1320_v44, %v300_v35 }
 0x1c0   :  { %v313_v43 = vrot.slane %v1320_v44, %v312_v38 }
 0x1c1   :  { %781 = vmatmul.mubr.bf16.vlgmr.msra.gmra.mxu0 %v1223_v46  ;;  %834 = vmatmul.mubr.bf16.vlgmr.msra.gmra.mxu1 %v1223_v46  ;;  %v285_v46 = vrot.slane %v1320_v44, %v284_v42  ;;  %v305_v42 = vrot.slane %v1320_v44, %v304_v37 }
 0x1c2   :  { %790 = vmatprep.mubr.bf16.mxu0 %v1033_v31  ;;  %843 = vmatprep.mubr.bf16.mxu1 %v1033_v31  ;;  %v296_v31 = vsub.s32 3, %v1313_v41 }
 0x1c4   :  { %v297_v49 = vrot.slane %v1320_v44, %v296_v31 }
 0x1c9   :  { %791 = vmatmul.mubr.bf16.gmra.mxu0 %v1253_v2  ;;  %844 = vmatmul.mubr.bf16.gmra.mxu1 %v1253_v2 }
 0x261   :  { %v676_v50 = vpop.f32.mrf.mxu0  ;;  %v729_v51 = vpop.f32.mrf.mxu1 }
 0x262   :  { %v677_v52 = vadd.f32 %v676_v50, %v285_v46  ;;  %v730_v53 = vadd.f32 %v729_v51, %v293_v47 }
 0x263   :  { %v678_v54 = vpop.f32.mrf.mxu0  ;;  %v731_v55 = vpop.f32.mrf.mxu1 }
 0x264   :  { %v854_v56 = vmax.f32 %v677_v52, 0.0  ;;  %v856_v57 = vmax.f32 %v730_v53, 0.0  ;;  %v679_v58 = vadd.f32 %v678_v54, %v289_v48  ;;  %v732_v59 = vadd.f32 %v731_v55, %v297_v49 }
 0x265   :  { %v680_v60 = vpop.f32.mrf.mxu0  ;;  %v733_v61 = vpop.f32.mrf.mxu1 }
 0x266   :  { %886 = vst [vmem:[%s1439_s7] sm:$0xff] %v854_v56  ;;  %888 = vst [vmem:[%s1439_s7 + $0x10] sm:$0xff] %v856_v57  ;;  %v855_v62 = vmax.f32 %v679_v58, 0.0  ;;  %v857_v63 = vmax.f32 %v732_v59, 0.0  ;;  %v681_v0 = vadd.f32 %v680_v60, %v285_v46  ;;  %v734_v1 = vadd.f32 %v733_v61, %v293_v47 }
 0x267   :  { %v682_v2 = vpop.f32.mrf.mxu0  ;;  %v735_v3 = vpop.f32.mrf.mxu1 }
 0x268   :  { %887 = vst [vmem:[%s1439_s7 + $0x8] sm:$0xff] %v855_v62  ;;  %889 = vst [vmem:[%s1439_s7 + $0x18] sm:$0xff] %v857_v63  ;;  %v862_v4 = vmax.f32 %v681_v0, 0.0  ;;  %v864_v5 = vmax.f32 %v734_v1, 0.0  ;;  %v683_v6 = vadd.f32 %v682_v2, %v289_v48  ;;  %v736_v7 = vadd.f32 %v735_v3, %v297_v49 }
 0x269   :  { %v686_v8 = vpop.f32.mrf.mxu0  ;;  %v739_v9 = vpop.f32.mrf.mxu1 }
 0x26a   :  { %894 = vst [vmem:[%s1439_s7 + $0x40] sm:$0xff] %v862_v4  ;;  %896 = vst [vmem:[%s1439_s7 + $0x50] sm:$0xff] %v864_v5  ;;  %v863_v10 = vmax.f32 %v683_v6, 0.0  ;;  %v865_v11 = vmax.f32 %v736_v7, 0.0  ;;  %v687_v12 = vadd.f32 %v686_v8, %v285_v46  ;;  %v740_v13 = vadd.f32 %v739_v9, %v293_v47 }
 0x26b   :  { %v688_v14 = vpop.f32.mrf.mxu0  ;;  %v741_v15 = vpop.f32.mrf.mxu1 }
 0x26c   :  { %895 = vst [vmem:[%s1439_s7 + $0x48] sm:$0xff] %v863_v10  ;;  %897 = vst [vmem:[%s1439_s7 + $0x58] sm:$0xff] %v865_v11  ;;  %v870_v16 = vmax.f32 %v687_v12, 0.0  ;;  %v872_v17 = vmax.f32 %v740_v13, 0.0  ;;  %v689_v18 = vadd.f32 %v688_v14, %v289_v48  ;;  %v742_v19 = vadd.f32 %v741_v15, %v297_v49 }
 0x26d   :  { %v690_v20 = vpop.f32.mrf.mxu0  ;;  %v743_v21 = vpop.f32.mrf.mxu1 }
 0x26e   :  { %902 = vst [vmem:[%s1439_s7 + $0x80] sm:$0xff] %v870_v16  ;;  %904 = vst [vmem:[%s1439_s7 + $0x90] sm:$0xff] %v872_v17  ;;  %v871_v22 = vmax.f32 %v689_v18, 0.0  ;;  %v873_v23 = vmax.f32 %v742_v19, 0.0  ;;  %v691_v24 = vadd.f32 %v690_v20, %v285_v46  ;;  %v744_v25 = vadd.f32 %v743_v21, %v293_v47 }
 0x26f   :  { %v692_v26 = vpop.f32.mrf.mxu0  ;;  %v745_v27 = vpop.f32.mrf.mxu1 }
 0x270   :  { %903 = vst [vmem:[%s1439_s7 + $0x88] sm:$0xff] %v871_v22  ;;  %905 = vst [vmem:[%s1439_s7 + $0x98] sm:$0xff] %v873_v23  ;;  %v878_v28 = vmax.f32 %v691_v24, 0.0  ;;  %v880_v29 = vmax.f32 %v744_v25, 0.0  ;;  %v693_v30 = vadd.f32 %v692_v26, %v289_v48  ;;  %v746_v32 = vadd.f32 %v745_v27, %v297_v49 }
 0x272   :  { %910 = vst [vmem:[%s1439_s7 + $0xc0] sm:$0xff] %v878_v28  ;;  %912 = vst [vmem:[%s1439_s7 + $0xd0] sm:$0xff] %v880_v29  ;;  %v879_v33 = vmax.f32 %v693_v30, 0.0  ;;  %v881_v34 = vmax.f32 %v746_v32, 0.0 }
 0x274   :  { %911 = vst [vmem:[%s1439_s7 + $0xc8] sm:$0xff] %v879_v33  ;;  %913 = vst [vmem:[%s1439_s7 + $0xd8] sm:$0xff] %v881_v34 }
 0x281   :  { %v782_v45 = vpop.f32.mrf.mxu0  ;;  %v835_v31 = vpop.f32.mrf.mxu1 }
 0x282   :  { %v783_v46 = vadd.f32 %v782_v45, %v301_v39  ;;  %v836_v47 = vadd.f32 %v835_v31, %v309_v40 }
 0x283   :  { %v784_v48 = vpop.f32.mrf.mxu0  ;;  %v837_v49 = vpop.f32.mrf.mxu1 }
 0x284   :  { %v858_v50 = vmax.f32 %v783_v46, 0.0  ;;  %v860_v51 = vmax.f32 %v836_v47, 0.0  ;;  %v785_v52 = vadd.f32 %v784_v48, %v305_v42  ;;  %v838_v53 = vadd.f32 %v837_v49, %v313_v43 }
 0x285   :  { %v786_v54 = vpop.f32.mrf.mxu0  ;;  %v839_v41 = vpop.f32.mrf.mxu1 }
 0x286   :  { %890 = vst [vmem:[%s1439_s7 + $0x20] sm:$0xff] %v858_v50  ;;  %892 = vst [vmem:[%s1439_s7 + $0x30] sm:$0xff] %v860_v51  ;;  %v859_v44 = vmax.f32 %v785_v52, 0.0  ;;  %v861_v55 = vmax.f32 %v838_v53, 0.0  ;;  %v787_v56 = vadd.f32 %v786_v54, %v301_v39  ;;  %v840_v57 = vadd.f32 %v839_v41, %v309_v40 }
 0x287   :  { %v788_v58 = vpop.f32.mrf.mxu0  ;;  %v841_v59 = vpop.f32.mrf.mxu1 }
 0x288   :  { %891 = vst [vmem:[%s1439_s7 + $0x28] sm:$0xff] %v859_v44  ;;  %893 = vst [vmem:[%s1439_s7 + $0x38] sm:$0xff] %v861_v55  ;;  %v866_v60 = vmax.f32 %v787_v56, 0.0  ;;  %v868_v61 = vmax.f32 %v840_v57, 0.0  ;;  %v789_v62 = vadd.f32 %v788_v58, %v305_v42  ;;  %v842_v63 = vadd.f32 %v841_v59, %v313_v43 }
 0x289   :  { %v792_v0 = vpop.f32.mrf.mxu0  ;;  %v845_v1 = vpop.f32.mrf.mxu1 }
 0x28a   :  { %898 = vst [vmem:[%s1439_s7 + $0x60] sm:$0xff] %v866_v60  ;;  %900 = vst [vmem:[%s1439_s7 + $0x70] sm:$0xff] %v868_v61  ;;  %v867_v2 = vmax.f32 %v789_v62, 0.0  ;;  %v869_v3 = vmax.f32 %v842_v63, 0.0  ;;  %v793_v4 = vadd.f32 %v792_v0, %v301_v39  ;;  %v846_v5 = vadd.f32 %v845_v1, %v309_v40 }
 0x28b   :  { %v794_v6 = vpop.f32.mrf.mxu0  ;;  %v847_v7 = vpop.f32.mrf.mxu1 }
 0x28c   :  { %899 = vst [vmem:[%s1439_s7 + $0x68] sm:$0xff] %v867_v2  ;;  %901 = vst [vmem:[%s1439_s7 + $0x78] sm:$0xff] %v869_v3  ;;  %v874_v8 = vmax.f32 %v793_v4, 0.0  ;;  %v876_v9 = vmax.f32 %v846_v5, 0.0  ;;  %v795_v10 = vadd.f32 %v794_v6, %v305_v42  ;;  %v848_v11 = vadd.f32 %v847_v7, %v313_v43 }
 0x28d   :  { %v796_v12 = vpop.f32.mrf.mxu0  ;;  %v849_v13 = vpop.f32.mrf.mxu1 }
 0x28e   :  { %906 = vst [vmem:[%s1439_s7 + $0xa0] sm:$0xff] %v874_v8  ;;  %908 = vst [vmem:[%s1439_s7 + $0xb0] sm:$0xff] %v876_v9  ;;  %v875_v14 = vmax.f32 %v795_v10, 0.0  ;;  %v877_v15 = vmax.f32 %v848_v11, 0.0  ;;  %v797_v16 = vadd.f32 %v796_v12, %v301_v39  ;;  %v850_v17 = vadd.f32 %v849_v13, %v309_v40 }
 0x28f   :  { %v798_v18 = vpop.f32.mrf.mxu0  ;;  %v851_v19 = vpop.f32.mrf.mxu1 }
 0x290   :  { %907 = vst [vmem:[%s1439_s7 + $0xa8] sm:$0xff] %v875_v14  ;;  %909 = vst [vmem:[%s1439_s7 + $0xb8] sm:$0xff] %v877_v15  ;;  %v882_v20 = vmax.f32 %v797_v16, 0.0  ;;  %v884_v21 = vmax.f32 %v850_v17, 0.0  ;;  %v799_v22 = vadd.f32 %v798_v18, %v305_v42  ;;  %v852_v23 = vadd.f32 %v851_v19, %v313_v43 }
 0x292   :  { %914 = vst [vmem:[%s1439_s7 + $0xe0] sm:$0xff] %v882_v20  ;;  %916 = vst [vmem:[%s1439_s7 + $0xf0] sm:$0xff] %v884_v21  ;;  %v883_v24 = vmax.f32 %v799_v22, 0.0  ;;  %v885_v25 = vmax.f32 %v852_v23, 0.0 }
 0x294   :  { %915 = vst [vmem:[%s1439_s7 + $0xe8] sm:$0xff] %v883_v24  ;;  %917 = vst [vmem:[%s1439_s7 + $0xf8] sm:$0xff] %v885_v25 }

</bundles_post_ra>
